<compile_context>
chip_gen: v7x
topology: tpu7x:2x2x1
jax: 0.10.0
libtpu: 0.0.40
codegen_flags: <defaults>
</compile_context>

<pallas_src>
import functools

import jax
import jax.numpy as jnp
from jax import lax
from jax.experimental import pallas as pl
from jax.experimental.pallas import tpu as pltpu


def rnn_recurrence_kernel(pad_t, unroll,
                          x_ref, wih_ref, whh_ref, bias_ref,
                          out_ref, h_scratch, u_scratch):
    """Grid = (batch_blocks, time_chunks).  Per chunk: one fused input
    projection matmul, then a serial tanh recurrence over the chunk."""
    c = pl.program_id(1)                 # time-chunk index (inner, "arbitrary")
    nc = pl.num_programs(1)
    tc, tb, Dp = x_ref.shape
    Hp = whh_ref.shape[1]

    @pl.when(c == 0)
    def _():
        h_scratch[...] = jnp.zeros_like(h_scratch)   # nn.RNN: h_0 = 0

    # ---- fused input projection: ONE MXU matmul per chunk -----------------
    # U[t] = x[t] @ W_ih^T + (b_ih + b_hh); no time dependence inside a chunk.
    x_flat = x_ref[...].reshape(tc * tb, Dp)
    u = jnp.dot(x_flat, wih_ref[...], preferred_element_type=jnp.float32)
    u_scratch[...] = (u + bias_ref[...]).reshape(tc, tb, Hp)

    if pad_t > 0:
        # Zero-prepadded time steps: x rows are 0 so u == bias there; force
        # U = 0 so those steps keep h exactly 0 (tanh(0 + 0 @ Whh) = 0).
        @pl.when(c == 0)
        def _():
            u_scratch[0:pad_t] = jnp.zeros((pad_t, tb, Hp), jnp.float32)

    whh = whh_ref[...]                   # (Hp, Hp) f32, VMEM resident

    def step(t, h):
        z = u_scratch[t] + jnp.dot(h, whh, preferred_element_type=jnp.float32)
        return jnp.tanh(z)

    h_final = lax.fori_loop(0, tc, step, h_scratch[...], unroll=unroll)

    @pl.when(c == nc - 1)
    def _():
        out_ref[...] = h_final.astype(out_ref.dtype)

    @pl.when(c < nc - 1)
    def _():
        h_scratch[...] = h_final          # carry hidden state across chunks


def _round_up(n, m):
    return ((n + m - 1) // m) * m


def _cdiv(a, b):
    return (a + b - 1) // b


def _divisor_leq(n, cap):
    d = max(1, min(n, cap))
    while n % d:
        d -= 1
    return d


def rnn_forward(x, w_ih, w_hh, b_ih, b_hh, *,
                batch_block=256,
                chunk_vmem_bytes=8 << 20):
    """x: (B, T, D) batch-first. w_ih: (H, D), w_hh: (H, H), b_ih/b_hh: (H,).
    Returns (B, H): hidden state after the last time step (== y[:, -1, :])."""
    B, T, D = x.shape
    H = w_ih.shape[0]

    Bp = _round_up(B, 8)          # sublane multiple (f32)
    Hp = _round_up(H, 128)        # lane multiple
    Dp = _round_up(D, 128)

    f32 = jnp.float32
    wih_t = jnp.pad(w_ih.astype(f32).T, ((0, Dp - D), (0, Hp - H)))      # (Dp, Hp)
    whh_t = jnp.pad(w_hh.astype(f32).T, ((0, Hp - H), (0, Hp - H)))      # (Hp, Hp)
    bias = jnp.pad((b_ih + b_hh).astype(f32), (0, Hp - H)).reshape(1, Hp)

    # ---- batch tiling: bounded vreg pressure, >=2 blocks for v7x megacore ---
    tb_cap = max(8, (128 * 1024) // (Hp * 4))   # carried f32 h <= ~32 vregs
    tb_cap = min(tb_cap, batch_block)
    if Bp >= 16:
        tb_cap = min(tb_cap, Bp // 2)            # both TensorCores get work
    tb = 8 * _divisor_leq(Bp // 8, max(1, tb_cap // 8))
    nb = Bp // tb

    # ---- time chunking (budget covers 2x double-buffered x chunk + U scratch)
    per_step_bytes = tb * (2 * Dp + Hp) * 4
    tc = max(1, min(T, chunk_vmem_bytes // per_step_bytes))
    nc = _cdiv(T, tc)
    Tp = nc * tc
    pad_t = Tp - T                                # zero steps PREPENDED

    # ---- time-major, zero-padded input (single XLA transpose + pad) --------
    x_tm = jnp.transpose(x.astype(f32), (1, 0, 2))                        # (T, B, D)
    x_tm = jnp.pad(x_tm, ((pad_t, 0), (0, Bp - B), (0, Dp - D)))          # (Tp, Bp, Dp)

    # ---- unroll heuristic: scale down as the live (tb, Hp) state grows -----
    h_vregs = (tb // 8) * (Hp // 128)
    if h_vregs <= 4:
        unroll = min(tc, 8)
    elif h_vregs <= 16:
        unroll = min(tc, 4)
    else:
        unroll = min(tc, 2)

    # ---- explicit VMEM budget (inputs/outputs double-buffered by Pallas) ---
    need = (2 * (tc * tb * Dp + Dp * Hp + Hp * Hp + Hp) * 4     # x chunk + weights + bias
            + (tc * tb * Hp + tb * Hp) * 4                      # U scratch + h scratch
            + 2 * tb * Hp * jnp.dtype(x.dtype).itemsize)        # output block
    vmem_limit = int(min(max(need + (4 << 20), 16 << 20), 100 << 20))

    kernel = functools.partial(rnn_recurrence_kernel, pad_t, unroll)

    out = pl.pallas_call(
        kernel,
        out_shape=jax.ShapeDtypeStruct((Bp, Hp), x.dtype),
        grid_spec=pltpu.PrefetchScalarGridSpec(
            num_scalar_prefetch=0,
            grid=(nb, nc),
            in_specs=[
                pl.BlockSpec((tc, tb, Dp), lambda b, c: (c, b, 0)),   # x time-chunk
                pl.BlockSpec((Dp, Hp), lambda b, c: (0, 0)),          # W_ih^T (constant)
                pl.BlockSpec((Hp, Hp), lambda b, c: (0, 0)),          # W_hh^T (constant)
                pl.BlockSpec((1, Hp), lambda b, c: (0, 0)),           # fused bias
            ],
            out_specs=pl.BlockSpec((tb, Hp), lambda b, c: (b, 0)),
            scratch_shapes=[
                pltpu.VMEM((tb, Hp), jnp.float32),        # carried hidden state
                pltpu.VMEM((tc, tb, Hp), jnp.float32),    # per-chunk U buffer
            ],
        ),
        compiler_params=pltpu.CompilerParams(
            dimension_semantics=("parallel", "arbitrary"),
            vmem_limit_bytes=vmem_limit),
    )(x_tm, wih_t, whh_t, bias)

    return out[:B, :H]


def rnn_reference(x, w_ih, w_hh, b_ih, b_hh):
    """Pure-JAX f32 reference mirroring torch.nn.RNN (tanh, batch_first)."""
    B, T, D = x.shape
    H = w_ih.shape[0]
    xc = x.astype(jnp.float32)
    wih = w_ih.astype(jnp.float32)
    whh = w_hh.astype(jnp.float32)
    bias = (b_ih + b_hh).astype(jnp.float32)
    h = jnp.zeros((B, H), jnp.float32)
    for t in range(T):
        z = (jnp.dot(xc[:, t, :], wih.T, preferred_element_type=jnp.float32)
             + jnp.dot(h, whh.T, preferred_element_type=jnp.float32)
             + bias)
        h = jnp.tanh(z)
    return h.astype(x.dtype)


if __name__ == "__main__":
    # Small shapes consistent with the module's forward: (batch, seq, input_dim)
    B, T, D, H = 2, 8, 32, 32

    key = jax.random.PRNGKey(0)
    kx, k1, k2, k3, k4 = jax.random.split(key, 5)

    x = jax.random.normal(kx, (B, T, D), dtype=jnp.float32)

    bound = 1.0 / (H ** 0.5)
    w_ih = jax.random.uniform(k1, (H, D), minval=-bound, maxval=bound, dtype=jnp.float32)
    w_hh = jax.random.uniform(k2, (H, H), minval=-bound, maxval=bound, dtype=jnp.float32)
    b_ih = jax.random.uniform(k3, (H,), minval=-bound, maxval=bound, dtype=jnp.float32)
    b_hh = jax.random.uniform(k4, (H,), minval=-bound, maxval=bound, dtype=jnp.float32)

    y_ref = rnn_reference(x, w_ih, w_hh, b_ih, b_hh)

    # Single-chunk path (tc == T).
    y = rnn_forward(x, w_ih, w_hh, b_ih, b_hh)
    y = jax.block_until_ready(y)
    assert y.shape == (B, H)
    assert jnp.allclose(y, y_ref, atol=5e-3, rtol=5e-3), "mismatch vs f32 reference"

    # Multi-chunk path with zero-prepadded time steps (T=8 -> tc=4, nc=2,
    # forced by a tiny per-chunk VMEM budget) to exercise the carried state.
    y2 = rnn_forward(x, w_ih, w_hh, b_ih, b_hh, chunk_vmem_bytes=50_000)
    y2 = jax.block_until_ready(y2)
    assert jnp.allclose(y2, y_ref, atol=5e-3, rtol=5e-3), "mismatch (chunked) vs reference"

    print("KERNEL_OK")
</pallas_src>

<mosaic_0001>
module attributes {stable_mosaic.version = 11 : i64} {
  func.func @rnn_recurrence_kernel(%arg0: i32, %arg1: i32, %arg2: memref<8x8x128xf32, #tpu.memory_space<vmem>>, %arg3: memref<128x128xf32, #tpu.memory_space<vmem>>, %arg4: memref<128x128xf32, #tpu.memory_space<vmem>>, %arg5: memref<1x128xf32, #tpu.memory_space<vmem>>, %arg6: memref<8x128xf32, #tpu.memory_space<vmem>>, %arg7: memref<8x128xf32, #tpu.memory_space<vmem>>, %arg8: memref<8x8x128xf32, #tpu.memory_space<vmem>>) attributes {dimension_semantics = [#tpu.dimension_semantics<parallel>, #tpu.dimension_semantics<arbitrary>], iteration_bounds = array<i64: 1, 1>, scalar_prefetch = 0 : i64, scratch_operands = 2 : i64, tpu.core_type = #tpu.core_type<tc>, window_params = [{transform_indices = @transform_0, window_bounds = array<i64: 8, 8, 128>}, {pipeline_mode = #tpu.pipeline_mode<synchronous>, transform_indices = @transform_1, window_bounds = array<i64: 128, 128>}, {pipeline_mode = #tpu.pipeline_mode<synchronous>, transform_indices = @transform_2, window_bounds = array<i64: 128, 128>}, {pipeline_mode = #tpu.pipeline_mode<synchronous>, transform_indices = @transform_3, window_bounds = array<i64: 1, 128>}, {transform_indices = @transform_4, window_bounds = array<i64: 8, 128>}]} {
    %c0_i32 = arith.constant 0 : i32
    %0 = arith.cmpi eq, %arg1, %c0_i32 : i32
    %1 = arith.extui %0 : i1 to i32
    %c0_i32_0 = arith.constant 0 : i32
    %2 = arith.cmpi ne, %1, %c0_i32_0 : i32
    scf.if %2 {
      %cst_43 = arith.constant 0.000000e+00 : f32
      %68 = vector.broadcast %cst_43 : f32 to vector<8x128xf32>
      %c0_44 = arith.constant 0 : index
      %c0_45 = arith.constant 0 : index
      %69 = vector.load %arg7[%c0_44, %c0_45] : memref<8x128xf32, #tpu.memory_space<vmem>>, vector<8x128xf32>
      tpu.vector_store %arg7[%c0_44, %c0_45], %68 {strides = array<i32>} : memref<8x128xf32, #tpu.memory_space<vmem>>, vector<8x128xf32>,
    } else {
    }
    %c0 = arith.constant 0 : index
    %c0_1 = arith.constant 0 : index
    %c0_2 = arith.constant 0 : index
    %3 = vector.load %arg2[%c0, %c0_1, %c0_2] : memref<8x8x128xf32, #tpu.memory_space<vmem>>, vector<8x8x128xf32>
    %4 = vector.shape_cast %3 : vector<8x8x128xf32> to vector<64x128xf32>
    %c0_3 = arith.constant 0 : index
    %c0_4 = arith.constant 0 : index
    %5 = vector.load %arg3[%c0_3, %c0_4] : memref<128x128xf32, #tpu.memory_space<vmem>>, vector<128x128xf32>
    %cst = arith.constant dense<0.000000e+00> : vector<64x128xf32>
    %6 = tpu.matmul %4, %5, %cst {dimension_numbers = #tpu.dot_dimension_numbers<[1], [0], [0], [1], [0, 0, 1, 1], [], []>} : vector<64x128xf32>, vector<128x128xf32>, vector<64x128xf32> -> vector<64x128xf32>
    %c0_5 = arith.constant 0 : index
    %c0_6 = arith.constant 0 : index
    %7 = vector.load %arg5[%c0_5, %c0_6] : memref<1x128xf32, #tpu.memory_space<vmem>>, vector<1x128xf32>
    %8 = vector.broadcast %7 : vector<1x128xf32> to vector<64x128xf32>
    %9 = arith.addf %6, %8 : vector<64x128xf32>
    %10 = vector.shape_cast %9 : vector<64x128xf32> to vector<8x8x128xf32>
    %c0_7 = arith.constant 0 : index
    %c0_8 = arith.constant 0 : index
    %c0_9 = arith.constant 0 : index
    %11 = vector.load %arg8[%c0_7, %c0_8, %c0_9] : memref<8x8x128xf32, #tpu.memory_space<vmem>>, vector<8x8x128xf32>
    tpu.vector_store %arg8[%c0_7, %c0_8, %c0_9], %10 {strides = array<i32>} : memref<8x8x128xf32, #tpu.memory_space<vmem>>, vector<8x8x128xf32>,
    %c0_10 = arith.constant 0 : index
    %c0_11 = arith.constant 0 : index
    %12 = vector.load %arg4[%c0_10, %c0_11] : memref<128x128xf32, #tpu.memory_space<vmem>>, vector<128x128xf32>
    %c0_12 = arith.constant 0 : index
    %c0_13 = arith.constant 0 : index
    %13 = vector.load %arg7[%c0_12, %c0_13] : memref<8x128xf32, #tpu.memory_space<vmem>>, vector<8x128xf32>
    %c0_i32_14 = arith.constant 0 : i32
    %14 = arith.index_cast %c0_i32_14 : i32 to index
    %c0_15 = arith.constant 0 : index
    %c0_16 = arith.constant 0 : index
    %15 = vector.load %arg8[%14, %c0_15, %c0_16] : memref<8x8x128xf32, #tpu.memory_space<vmem>>, vector<1x8x128xf32>
    %16 = vector.shape_cast %15 : vector<1x8x128xf32> to vector<8x128xf32>
    %cst_17 = arith.constant dense<0.000000e+00> : vector<8x128xf32>
    %17 = tpu.matmul %13, %12, %cst_17 {dimension_numbers = #tpu.dot_dimension_numbers<[1], [0], [0], [1], [0, 0, 1, 1], [], []>} : vector<8x128xf32>, vector<128x128xf32>, vector<8x128xf32> -> vector<8x128xf32>
    %18 = arith.addf %16, %17 : vector<8x128xf32>
    %19 = math.tanh %18 : vector<8x128xf32>
    %c1_i32 = arith.constant 1 : i32
    %20 = arith.index_cast %c1_i32 : i32 to index
    %c0_18 = arith.constant 0 : index
    %c0_19 = arith.constant 0 : index
    %21 = vector.load %arg8[%20, %c0_18, %c0_19] : memref<8x8x128xf32, #tpu.memory_space<vmem>>, vector<1x8x128xf32>
    %22 = vector.shape_cast %21 : vector<1x8x128xf32> to vector<8x128xf32>
    %cst_20 = arith.constant dense<0.000000e+00> : vector<8x128xf32>
    %23 = tpu.matmul %19, %12, %cst_20 {dimension_numbers = #tpu.dot_dimension_numbers<[1], [0], [0], [1], [0, 0, 1, 1], [], []>} : vector<8x128xf32>, vector<128x128xf32>, vector<8x128xf32> -> vector<8x128xf32>
    %24 = arith.addf %22, %23 : vector<8x128xf32>
    %25 = math.tanh %24 : vector<8x128xf32>
    %c2_i32 = arith.constant 2 : i32
    %26 = arith.index_cast %c2_i32 : i32 to index
    %c0_21 = arith.constant 0 : index
    %c0_22 = arith.constant 0 : index
    %27 = vector.load %arg8[%26, %c0_21, %c0_22] : memref<8x8x128xf32, #tpu.memory_space<vmem>>, vector<1x8x128xf32>
    %28 = vector.shape_cast %27 : vector<1x8x128xf32> to vector<8x128xf32>
    %cst_23 = arith.constant dense<0.000000e+00> : vector<8x128xf32>
    %29 = tpu.matmul %25, %12, %cst_23 {dimension_numbers = #tpu.dot_dimension_numbers<[1], [0], [0], [1], [0, 0, 1, 1], [], []>} : vector<8x128xf32>, vector<128x128xf32>, vector<8x128xf32> -> vector<8x128xf32>
    %30 = arith.addf %28, %29 : vector<8x128xf32>
    %31 = math.tanh %30 : vector<8x128xf32>
    %c3_i32 = arith.constant 3 : i32
    %32 = arith.index_cast %c3_i32 : i32 to index
    %c0_24 = arith.constant 0 : index
    %c0_25 = arith.constant 0 : index
    %33 = vector.load %arg8[%32, %c0_24, %c0_25] : memref<8x8x128xf32, #tpu.memory_space<vmem>>, vector<1x8x128xf32>
    %34 = vector.shape_cast %33 : vector<1x8x128xf32> to vector<8x128xf32>
    %cst_26 = arith.constant dense<0.000000e+00> : vector<8x128xf32>
    %35 = tpu.matmul %31, %12, %cst_26 {dimension_numbers = #tpu.dot_dimension_numbers<[1], [0], [0], [1], [0, 0, 1, 1], [], []>} : vector<8x128xf32>, vector<128x128xf32>, vector<8x128xf32> -> vector<8x128xf32>
    %36 = arith.addf %34, %35 : vector<8x128xf32>
    %37 = math.tanh %36 : vector<8x128xf32>
    %c4_i32 = arith.constant 4 : i32
    %38 = arith.index_cast %c4_i32 : i32 to index
    %c0_27 = arith.constant 0 : index
    %c0_28 = arith.constant 0 : index
    %39 = vector.load %arg8[%38, %c0_27, %c0_28] : memref<8x8x128xf32, #tpu.memory_space<vmem>>, vector<1x8x128xf32>
    %40 = vector.shape_cast %39 : vector<1x8x128xf32> to vector<8x128xf32>
    %cst_29 = arith.constant dense<0.000000e+00> : vector<8x128xf32>
    %41 = tpu.matmul %37, %12, %cst_29 {dimension_numbers = #tpu.dot_dimension_numbers<[1], [0], [0], [1], [0, 0, 1, 1], [], []>} : vector<8x128xf32>, vector<128x128xf32>, vector<8x128xf32> -> vector<8x128xf32>
    %42 = arith.addf %40, %41 : vector<8x128xf32>
    %43 = math.tanh %42 : vector<8x128xf32>
    %c5_i32 = arith.constant 5 : i32
    %44 = arith.index_cast %c5_i32 : i32 to index
    %c0_30 = arith.constant 0 : index
    %c0_31 = arith.constant 0 : index
    %45 = vector.load %arg8[%44, %c0_30, %c0_31] : memref<8x8x128xf32, #tpu.memory_space<vmem>>, vector<1x8x128xf32>
    %46 = vector.shape_cast %45 : vector<1x8x128xf32> to vector<8x128xf32>
    %cst_32 = arith.constant dense<0.000000e+00> : vector<8x128xf32>
    %47 = tpu.matmul %43, %12, %cst_32 {dimension_numbers = #tpu.dot_dimension_numbers<[1], [0], [0], [1], [0, 0, 1, 1], [], []>} : vector<8x128xf32>, vector<128x128xf32>, vector<8x128xf32> -> vector<8x128xf32>
    %48 = arith.addf %46, %47 : vector<8x128xf32>
    %49 = math.tanh %48 : vector<8x128xf32>
    %c6_i32 = arith.constant 6 : i32
    %50 = arith.index_cast %c6_i32 : i32 to index
    %c0_33 = arith.constant 0 : index
    %c0_34 = arith.constant 0 : index
    %51 = vector.load %arg8[%50, %c0_33, %c0_34] : memref<8x8x128xf32, #tpu.memory_space<vmem>>, vector<1x8x128xf32>
    %52 = vector.shape_cast %51 : vector<1x8x128xf32> to vector<8x128xf32>
    %cst_35 = arith.constant dense<0.000000e+00> : vector<8x128xf32>
    %53 = tpu.matmul %49, %12, %cst_35 {dimension_numbers = #tpu.dot_dimension_numbers<[1], [0], [0], [1], [0, 0, 1, 1], [], []>} : vector<8x128xf32>, vector<128x128xf32>, vector<8x128xf32> -> vector<8x128xf32>
    %54 = arith.addf %52, %53 : vector<8x128xf32>
    %55 = math.tanh %54 : vector<8x128xf32>
    %c7_i32 = arith.constant 7 : i32
    %56 = arith.index_cast %c7_i32 : i32 to index
    %c0_36 = arith.constant 0 : index
    %c0_37 = arith.constant 0 : index
    %57 = vector.load %arg8[%56, %c0_36, %c0_37] : memref<8x8x128xf32, #tpu.memory_space<vmem>>, vector<1x8x128xf32>
    %58 = vector.shape_cast %57 : vector<1x8x128xf32> to vector<8x128xf32>
    %cst_38 = arith.constant dense<0.000000e+00> : vector<8x128xf32>
    %59 = tpu.matmul %55, %12, %cst_38 {dimension_numbers = #tpu.dot_dimension_numbers<[1], [0], [0], [1], [0, 0, 1, 1], [], []>} : vector<8x128xf32>, vector<128x128xf32>, vector<8x128xf32> -> vector<8x128xf32>
    %60 = arith.addf %58, %59 : vector<8x128xf32>
    %61 = math.tanh %60 : vector<8x128xf32>
    %c8_i32 = arith.constant 8 : i32
    %c0_i32_39 = arith.constant 0 : i32
    %62 = arith.cmpi eq, %arg1, %c0_i32_39 : i32
    %63 = arith.extui %62 : i1 to i32
    %c0_i32_40 = arith.constant 0 : i32
    %64 = arith.cmpi ne, %63, %c0_i32_40 : i32
    scf.if %64 {
      %c0_43 = arith.constant 0 : index
      %c0_44 = arith.constant 0 : index
      %68 = vector.load %arg6[%c0_43, %c0_44] : memref<8x128xf32, #tpu.memory_space<vmem>>, vector<8x128xf32>
      tpu.vector_store %arg6[%c0_43, %c0_44], %61 {strides = array<i32>} : memref<8x128xf32, #tpu.memory_space<vmem>>, vector<8x128xf32>,
    } else {
    }
    %c0_i32_41 = arith.constant 0 : i32
    %65 = arith.cmpi slt, %arg1, %c0_i32_41 : i32
    %66 = arith.extui %65 : i1 to i32
    %c0_i32_42 = arith.constant 0 : i32
    %67 = arith.cmpi ne, %66, %c0_i32_42 : i32
    scf.if %67 {
      %c0_43 = arith.constant 0 : index
      %c0_44 = arith.constant 0 : index
      %68 = vector.load %arg7[%c0_43, %c0_44] : memref<8x128xf32, #tpu.memory_space<vmem>>, vector<8x128xf32>
      tpu.vector_store %arg7[%c0_43, %c0_44], %61 {strides = array<i32>} : memref<8x128xf32, #tpu.memory_space<vmem>>, vector<8x128xf32>,
    } else {
    }
    return
  }
  func.func @transform_0(%arg0: i32, %arg1: i32) -> (i32, i32, i32) {
    %c0_i32 = arith.constant 0 : i32
    %c0_i32_0 = arith.constant 0 : i32
    return %arg1, %arg0, %c0_i32 : i32, i32, i32
  }
  func.func @transform_1(%arg0: i32, %arg1: i32) -> (i32, i32) {
    %c0_i32 = arith.constant 0 : i32
    %c0_i32_0 = arith.constant 0 : i32
    %c0_i32_1 = arith.constant 0 : i32
    return %c0_i32, %c0_i32_0 : i32, i32
  }
  func.func @transform_2(%arg0: i32, %arg1: i32) -> (i32, i32) {
    %c0_i32 = arith.constant 0 : i32
    %c0_i32_0 = arith.constant 0 : i32
    %c0_i32_1 = arith.constant 0 : i32
    return %c0_i32, %c0_i32_0 : i32, i32
  }
  func.func @transform_3(%arg0: i32, %arg1: i32) -> (i32, i32) {
    %c0_i32 = arith.constant 0 : i32
    %c0_i32_0 = arith.constant 0 : i32
    %c0_i32_1 = arith.constant 0 : i32
    return %c0_i32, %c0_i32_0 : i32, i32
  }
  func.func @transform_4(%arg0: i32, %arg1: i32) -> (i32, i32) {
    %c0_i32 = arith.constant 0 : i32
    %c0_i32_0 = arith.constant 0 : i32
    return %arg0, %c0_i32 : i32, i32
  }
}

</mosaic_0001>

<bundles_post_ra>
// kernel: tpu_custom_call.1
= control target key start
LH: loop header
LB: loop body
LE: loop exit
PB: predicated region body
PF: predicated region fallthrough
CT: control target
= control target key end

     0   :  { %9 = vsyncpa [#allocation5], 0  ;;  %s1953_s0 = inlined_call_operand.hbm [shape: f32[8,8,128], index: 0, kind: input, shape index: {}]   ;;  %s1954_s1 = inlined_call_operand.hbm [shape: f32[128,128], index: 1, kind: input, shape index: {}]   ;;  %s1955_s2 = inlined_call_operand.hbm [shape: f32[128,128], index: 2, kind: input, shape index: {}]   ;;  %s1956_s3 = inlined_call_operand.vmem [shape: f32[1,128], index: 3, kind: input, shape index: {}]   ;;  %s1957_s4 = inlined_call_operand.hbm [shape: f32[8,128], index: 4, kind: output, shape index: {}]  }
   0x1   :  { %10 = vsyncpa [#allocation8], 0 }
   0x2   :  { %11 = vsyncpa [#allocation6], 0  ;;  %s1669_s15 = smov [#allocation7]   ;;  %s1670_s17 = smov [#allocation4]  }
   0x3   :  { %s29_s16 = sshll.u32 %s1669_s15, 4  ;;  %s17_s18 = sshll.u32 %s1670_s17, 4  ;;  %s30_s16 = int_to_ptr.vmem [resolvable:$true] %s29_s16  ;;  %s1703_s18 = int_to_ptr.vmem [resolvable:$true] %s17_s18 }
   0x4   :  { %s1575_s21 = scalar_lea.hbm %s1954_s1, 2048 }
   0x5   :  { %p1576_p0 = scmp.ne.s32.totalorder %s1954_s1, %s1575_s21  ;;  %p1579_p1 = scmp.lt.u32.totalorder %s1575_s21, %s1954_s1 }
   0x7   :  { %p1581_p2 = pnand %p1579_p1, %p1576_p0 }
   0x9   :  { %1584 = shalt.err (!%p1581_p2)
}
   0xa   :  { %s1585_s26 = scalar_lea.vmem %s30_s16, 2048  ;;  %p1590_p4 = scmp.lt.s32.totalorder %s30_s16, %s30_s16 }
   0xb   :  { %p1586_p3 = scmp.ne.s32.totalorder %s30_s16, %s1585_s26  ;;  %p1591_p5 = scmp.lt.s32.totalorder %s1585_s26, %s1585_s26 }
   0xd   :  { %p1592_p6 = por %p1591_p5, %p1590_p4 }
   0xf   :  { %p1593_p7 = pnand %p1592_p6, %p1586_p3 }
  0x11   :  { %1596 = shalt.err (!%p1593_p7)
}
  0x12   :  { %s1671_s27 = smov 128   ;;  %s1672_s28 = smov 8  }
  0x13   :  { %35 = dma.hbm_to_vmem [thread:$0]  %s1954_s1, 2048, %s30_s16, [#allocation8], %s1671_s27, %s1671_s27, %s1672_s28  }
  0x14   :  { %s1597_s7 = scalar_lea.hbm %s1953_s0, 1024 }
  0x15   :  { %p1598_p8 = scmp.ne.s32.totalorder %s1953_s0, %s1597_s7  ;;  %p1601_p9 = scmp.lt.u32.totalorder %s1597_s7, %s1953_s0 }
  0x17   :  { %p1603_p10 = pnand %p1601_p9, %p1598_p8 }
  0x19   :  { %1606 = shalt.err (!%p1603_p10)
}
  0x1a   :  { %s1607_s12 = scalar_lea.vmem %s1703_s18, 1024  ;;  %p1612_p12 = scmp.lt.s32.totalorder %s1703_s18, %s1703_s18 }
  0x1b   :  { %p1608_p11 = scmp.ne.s32.totalorder %s1703_s18, %s1607_s12  ;;  %p1613_p13 = scmp.lt.s32.totalorder %s1607_s12, %s1607_s12 }
  0x1d   :  { %p1614_p0 = por %p1613_p13, %p1612_p12 }
  0x1f   :  { %p1615_p1 = pnand %p1614_p0, %p1608_p11 }
  0x21   :  { %1618 = shalt.err (!%p1615_p1)
}
  0x22   :  { %23 = dma.hbm_to_vmem [thread:$0]  %s1953_s0, 1024, %s1703_s18, [#allocation5], %s1671_s27, %s1671_s27, %s1672_s28  }
  0x23   :  { %s1673_s14 = smov [#allocation9]   ;;  %s1619_s19 = scalar_lea.hbm %s1955_s2, 2048 }
  0x24   :  { %s41_s15 = sshll.u32 %s1673_s14, 4  ;;  %p1620_p2 = scmp.ne.s32.totalorder %s1955_s2, %s1619_s19  ;;  %s42_s15 = int_to_ptr.vmem [resolvable:$true] %s41_s15 }
  0x25   :  { %p1623_p3 = scmp.lt.u32.totalorder %s1619_s19, %s1955_s2 }
  0x27   :  { %p1625_p4 = pnand %p1623_p3, %p1620_p2 }
  0x29   :  { %1628 = shalt.err (!%p1625_p4)
}
  0x2a   :  { %s1629_s24 = scalar_lea.vmem %s42_s15, 2048  ;;  %p1634_p6 = scmp.lt.s32.totalorder %s42_s15, %s42_s15 }
  0x2b   :  { %p1630_p5 = scmp.ne.s32.totalorder %s42_s15, %s1629_s24  ;;  %p1635_p7 = scmp.lt.s32.totalorder %s1629_s24, %s1629_s24 }
  0x2d   :  { %p1636_p8 = por %p1635_p7, %p1634_p6 }
  0x2f   :  { %p1637_p9 = pnand %p1636_p8, %p1630_p5 }
  0x31   :  { %1640 = shalt.err (!%p1637_p9)
}
  0x32   :  { %47 = dma.hbm_to_vmem [thread:$0]  %s1955_s2, 2048, %s42_s15, [#allocation8], %s1671_s27, %s1671_s27, %s1672_s28  }
  0x33   :  { %1663 = dma.done.wait [#allocation5], 1024  }
  0x34   :  { %1664 = vsyncadd [#allocation5], 4294966272 }
  0x35   :  { %1665 = dma.done.wait [#allocation8], 4096  }
  0x36   :  { %1666 = vsyncadd [#allocation8], 4294963200  ;;  %v1674_v0 = vmov 0.0|0.0   ;;  %vm1675_vm0 = vmmov 0   ;;  %v1676_v1 = vmov 0.0   ;;  %v72_v2 = vld [vmem:[#allocation7] sm:$0xff] }
  0x37   :  { %1358 = vmatprep.subr.bf16.mxu1 %v1674_v0  ;;  %1078 = vmatprep.mubr.msk.f32.mxu1 %vm1675_vm0, %v1676_v1  ;;  %v73_v3 = vld [vmem:[#allocation7 + $0x8] sm:$0xff]  ;;  %v208_v4 = vld [vmem:[#allocation9] sm:$0xff]  ;;  %v74_v7 = vld [vmem:[#allocation7 + $0x10] sm:$0xff] }
  0x38   :  { %v1326_v5 = vpack.c.bf16 %v73_v3, %v72_v2  ;;  %v209_v6 = vld [vmem:[#allocation9 + $0x8] sm:$0xff]  ;;  %v75_v8 = vld [vmem:[#allocation7 + $0x18] sm:$0xff]  ;;  %v210_v11 = vld [vmem:[#allocation9 + $0x10] sm:$0xff] }
  0x39   :  { %v1758_v9 = vpack.c.bf16 %v209_v6, %v208_v4  ;;  %v1330_v10 = vpack.c.bf16 %v75_v8, %v74_v7  ;;  %v211_v12 = vld [vmem:[#allocation9 + $0x18] sm:$0xff]  ;;  %v76_v13 = vld [vmem:[#allocation7 + $0x20] sm:$0xff]  ;;  %v77_v14 = vld [vmem:[#allocation7 + $0x28] sm:$0xff] }
  0x3a   :  { %1327 = vmatprep.subr.bf16.mxu0 %v1326_v5  ;;  %v1761_v15 = vpack.c.bf16 %v211_v12, %v210_v11  ;;  %v1334_v16 = vpack.c.bf16 %v77_v14, %v76_v13  ;;  %v212_v17 = vld [vmem:[#allocation9 + $0x20] sm:$0xff]  ;;  %v213_v18 = vld [vmem:[#allocation9 + $0x28] sm:$0xff]  ;;  %v78_v19 = vld [vmem:[#allocation7 + $0x30] sm:$0xff] }
  0x3b   :  { %1329 = vmatpush3.bf16.msra.mxu0 %v1326_v5  ;;  %1360 = vmatpush3.bf16.msra.mxu1 %v1758_v9  ;;  %v79_v20 = vld [vmem:[#allocation7 + $0x38] sm:$0xff]  ;;  %v1765_v21 = vpack.c.bf16 %v213_v18, %v212_v17  ;;  %v214_v23 = vld [vmem:[#allocation9 + $0x30] sm:$0xff]  ;;  %v80_v25 = vld [vmem:[#allocation7 + $0x40] sm:$0xff] }
  0x3c   :  { %1331 = vmatprep.subr.bf16.mxu0 %v1330_v10  ;;  %1361 = vmatprep.subr.bf16.mxu1 %v1674_v0  ;;  %v1338_v22 = vpack.c.bf16 %v79_v20, %v78_v19  ;;  %v215_v24 = vld [vmem:[#allocation9 + $0x38] sm:$0xff]  ;;  %v81_v26 = vld [vmem:[#allocation7 + $0x48] sm:$0xff]  ;;  %v64_v27 = vld [vmem:[#allocation4] sm:$0xff] }
  0x3d   :  { %1034 = vmatprep.mubr.f32.mxu0 %v64_v27  ;;  %v1769_v28 = vpack.c.bf16 %v215_v24, %v214_v23  ;;  %v1342_v29 = vpack.c.bf16 %v81_v26, %v80_v25  ;;  %v216_v30 = vld [vmem:[#allocation9 + $0x40] sm:$0xff]  ;;  %v217_v31 = vld [vmem:[#allocation9 + $0x48] sm:$0xff]  ;;  %v82_v32 = vld [vmem:[#allocation7 + $0x50] sm:$0xff] }
  0x3e   :  { %v83_v33 = vld [vmem:[#allocation7 + $0x58] sm:$0xff]  ;;  %v1773_v34 = vpack.c.bf16 %v217_v31, %v216_v30  ;;  %v218_v36 = vld [vmem:[#allocation9 + $0x50] sm:$0xff]  ;;  %v84_v38 = vld [vmem:[#allocation7 + $0x60] sm:$0xff] }
  0x3f   :  { %1333 = vmatpush3.bf16.msra.mxu0 %v1330_v10  ;;  %1363 = vmatpush3.bf16.msra.mxu1 %v1761_v15  ;;  %v1346_v35 = vpack.c.bf16 %v83_v33, %v82_v32  ;;  %v219_v37 = vld [vmem:[#allocation9 + $0x58] sm:$0xff]  ;;  %v85_v39 = vld [vmem:[#allocation7 + $0x68] sm:$0xff]  ;;  %v220_v42 = vld [vmem:[#allocation9 + $0x60] sm:$0xff] }
  0x40   :  { %1335 = vmatprep.subr.bf16.mxu0 %v1334_v16  ;;  %1364 = vmatprep.subr.bf16.mxu1 %v1674_v0  ;;  %v1777_v40 = vpack.c.bf16 %v219_v37, %v218_v36  ;;  %v1350_v41 = vpack.c.bf16 %v85_v39, %v84_v38  ;;  %v221_v43 = vld [vmem:[#allocation9 + $0x68] sm:$0xff]  ;;  %v86_v44 = vld [vmem:[#allocation7 + $0x70] sm:$0xff]  ;;  %v87_v45 = vld [vmem:[#allocation7 + $0x78] sm:$0xff] }
  0x41   :  { %v1781_v46 = vpack.c.bf16 %v221_v43, %v220_v42  ;;  %v1354_v47 = vpack.c.bf16 %v87_v45, %v86_v44  ;;  %v222_v48 = vld [vmem:[#allocation9 + $0x70] sm:$0xff]  ;;  %v223_v49 = vld [vmem:[#allocation9 + $0x78] sm:$0xff]  ;;  %v65_v51 = vld [vmem:[#allocation4 + $0x8] sm:$0xff] }
  0x42   :  { %v1785_v50 = vpack.c.bf16 %v223_v49, %v222_v48  ;;  %v66_v52 = vld [vmem:[#allocation4 + $0x10] sm:$0xff]  ;;  %v67_v53 = vld [vmem:[#allocation4 + $0x18] sm:$0xff]  ;;  %v68_v54 = vld [vmem:[#allocation4 + $0x20] sm:$0xff] }
  0x43   :  { %1337 = vmatpush3.bf16.msra.mxu0 %v1334_v16  ;;  %1366 = vmatpush3.bf16.msra.mxu1 %v1765_v21  ;;  %v69_v55 = vld [vmem:[#allocation4 + $0x28] sm:$0xff]  ;;  %v70_v56 = vld [vmem:[#allocation4 + $0x30] sm:$0xff]  ;;  %v71_v57 = vld [vmem:[#allocation4 + $0x38] sm:$0xff] }
  0x44   :  { %1339 = vmatprep.subr.bf16.mxu0 %v1338_v22  ;;  %1367 = vmatprep.subr.bf16.mxu1 %v1674_v0  ;;  %v1831_v58 = vld [vmem:[%s1956_s3] ss:$0 sm:$0xff]  ;;  %s1677_s3 = smov [#allocation10]  }
  0x45   :  { %s831_s26 = sshll.u32 %s1677_s3, 4  ;;  %s832_s26 = int_to_ptr.vmem [resolvable:$true] %s831_s26 }
  0x46   :  { %s1641_s27 = scalar_lea.vmem %s832_s26, 128  ;;  %p1646_p11 = scmp.lt.s32.totalorder %s832_s26, %s832_s26 }
  0x47   :  { %1341 = vmatpush3.bf16.msra.mxu0 %v1338_v22  ;;  %1369 = vmatpush3.bf16.msra.mxu1 %v1769_v28  ;;  %p1642_p10 = scmp.ne.s32.totalorder %s832_s26, %s1641_s27  ;;  %p1647_p12 = scmp.lt.s32.totalorder %s1641_s27, %s1641_s27 }
  0x48   :  { %1343 = vmatprep.subr.bf16.mxu0 %v1342_v29  ;;  %1370 = vmatprep.subr.bf16.mxu1 %v1674_v0 }
  0x49   :  { %p1648_p13 = por %p1647_p12, %p1646_p11 }
  0x4b   :  { %1345 = vmatpush3.bf16.msra.mxu0 %v1342_v29  ;;  %1372 = vmatpush3.bf16.msra.mxu1 %v1773_v34  ;;  %p1649_p0 = pnand %p1648_p13, %p1642_p10 }
  0x4c   :  { %1347 = vmatprep.subr.bf16.mxu0 %v1346_v35  ;;  %1373 = vmatprep.subr.bf16.mxu1 %v1674_v0 }
  0x4f   :  { %1349 = vmatpush3.bf16.msra.mxu0 %v1346_v35  ;;  %1375 = vmatpush3.bf16.msra.mxu1 %v1777_v40 }
  0x50   :  { %1351 = vmatprep.subr.bf16.mxu0 %v1350_v41  ;;  %1376 = vmatprep.subr.bf16.mxu1 %v1674_v0 }
  0x53   :  { %1353 = vmatpush3.bf16.msra.mxu0 %v1350_v41  ;;  %1378 = vmatpush3.bf16.msra.mxu1 %v1781_v46 }
  0x54   :  { %1355 = vmatprep.subr.bf16.mxu0 %v1354_v47  ;;  %1379 = vmatprep.subr.bf16.mxu1 %v1674_v0 }
  0x57   :  { %1357 = vmatpush3.bf16.msra.mxu0 %v1354_v47  ;;  %1381 = vmatpush3.bf16.msra.mxu1 %v1785_v50 }
  0x58   :  { %1382 = vmatprep.subr.bf16.mxu0 %v1674_v0  ;;  %1406 = vmatprep.subr.bf16.mxu1 %v1674_v0 }
  0x5a   :  { %1035 = vmatmul.mubr.f32.vlgmr.msra.gmra.mrb[0].mxu0 %v65_v51  ;;  %1079 = vmatmul.mubr.f32.vlgmr.msra.gmra.mrb[0].mxu1 %v1676_v1 }
  0x5b   :  { %1384 = vmatpush3.bf16.msra.mxu0 %v1758_v9  ;;  %1408 = vmatpush3.bf16.msra.mxu1 %v1758_v9 }
  0x5c   :  { %1385 = vmatprep.subr.bf16.mxu0 %v1674_v0  ;;  %1409 = vmatprep.subr.bf16.mxu1 %v1674_v0 }
  0x5d   :  { %1148 = vmatprep.mubr.msk.f32.mxu1 %vm1675_vm0, %v1676_v1  ;;  %1037 = vmatprep.mubr.f32.mxu0 %v66_v52 }
  0x5e   :  { %1038 = vmatmul.mubr.f32.gmra.mrb[2].mxu0 %v67_v53 }
  0x5f   :  { %1387 = vmatpush3.bf16.msra.mxu0 %v1761_v15  ;;  %1411 = vmatpush3.bf16.msra.mxu1 %v1761_v15 }
  0x60   :  { %1388 = vmatprep.subr.bf16.mxu0 %v1674_v0  ;;  %1412 = vmatprep.subr.bf16.mxu1 %v1674_v0 }
  0x61   :  { %1040 = vmatprep.mubr.f32.mxu0 %v68_v54 }
  0x62   :  { %1041 = vmatmul.mubr.f32.gmra.mrb[4].mxu0 %v69_v55 }
  0x63   :  { %1390 = vmatpush3.bf16.msra.mxu0 %v1765_v21  ;;  %1414 = vmatpush3.bf16.msra.mxu1 %v1765_v21 }
  0x64   :  { %1391 = vmatprep.subr.bf16.mxu0 %v1674_v0  ;;  %1415 = vmatprep.subr.bf16.mxu1 %v1674_v0 }
  0x65   :  { %1043 = vmatprep.mubr.f32.mxu0 %v70_v56 }
  0x66   :  { %1044 = vmatmul.mubr.f32.gmra.mrb[6].mxu0 %v71_v57 }
  0x67   :  { %1393 = vmatpush3.bf16.msra.mxu0 %v1769_v28  ;;  %1417 = vmatpush3.bf16.msra.mxu1 %v1769_v28 }
  0x68   :  { %1394 = vmatprep.subr.bf16.mxu0 %v1674_v0  ;;  %1418 = vmatprep.subr.bf16.mxu1 %v1674_v0 }
  0x69   :  { %1113 = vmatprep.mubr.msk.f32.mxu0 %vm1675_vm0, %v1676_v1 }
  0x6b   :  { %1396 = vmatpush3.bf16.msra.mxu0 %v1773_v34  ;;  %1420 = vmatpush3.bf16.msra.mxu1 %v1773_v34 }
  0x6c   :  { %1397 = vmatprep.subr.bf16.mxu0 %v1674_v0  ;;  %1421 = vmatprep.subr.bf16.mxu1 %v1674_v0 }
  0x6f   :  { %1399 = vmatpush3.bf16.msra.mxu0 %v1777_v40  ;;  %1423 = vmatpush3.bf16.msra.mxu1 %v1777_v40 }
  0x70   :  { %1400 = vmatprep.subr.bf16.mxu0 %v1674_v0  ;;  %1424 = vmatprep.subr.bf16.mxu1 %v1674_v0 }
  0x73   :  { %1402 = vmatpush3.bf16.msra.mxu0 %v1781_v46  ;;  %1426 = vmatpush3.bf16.msra.mxu1 %v1781_v46 }
  0x74   :  { %1403 = vmatprep.subr.bf16.mxu0 %v1674_v0  ;;  %1427 = vmatprep.subr.bf16.mxu1 %v1674_v0 }
  0x77   :  { %1405 = vmatpush3.bf16.msra.mxu0 %v1785_v50  ;;  %1429 = vmatpush3.bf16.msra.mxu1 %v1785_v50 }
  0x78   :  { %1430 = vmatprep.subr.bf16.mxu0 %v1674_v0  ;;  %1454 = vmatprep.subr.bf16.mxu1 %v1674_v0 }
 0x12d   :  { %v1036_v59 = vpop.f32.mrb[0].mxu0  ;;  %v292_v60 = vpop.f32.mrb[0].mxu1 }
 0x12e   :  { %v161_v61 = vpop.f32.mrb[1].mxu0  ;;  %v1080_v62 = vpop.f32.mrb[1].mxu1  ;;  %v167_v11 = vadd.f32 %v1036_v59, %v1831_v58 }
 0x12f   :  { %v162_v63 = vadd.f32 %v1831_v58, %v161_v61 }
 0x131   :  { %v296_v2 = vadd.f32 %v292_v60, %v162_v63  ;;  %v1039_v4 = vpop.f32.mrb[2].mxu0 }
 0x132   :  { %v171_v5 = vpop.f32.mrb[3].mxu0  ;;  %v177_v23 = vadd.f32 %v1039_v4, %v1831_v58 }
 0x133   :  { %1559 = vtanh.f32 %v296_v2  ;;  %v172_v17 = vadd.f32 %v1831_v58, %v171_v5 }
 0x135   :  { %v1852_v6 = vpop.f32.mrb[4].mxu0 }
 0x136   :  { %v1854_v7 = vpop.f32.mrb[5].mxu0 }
 0x137   :  { %v182_v29 = vadd.f32 %v1831_v58, %v1854_v7 }
 0x139   :  { %v1856_v8 = vpop.f32.mrb[6].mxu0 }
 0x13a   :  { %v1858_v10 = vpop.f32.mrb[7].mxu0 }
 0x13d   :  { %v1560_v3 = vpop.eup %1559 }
 0x13e   :  { %1114 = vmatmul.mubr.f32.vlgmr.msra.gmra.mrb[8].mxu0 %v1560_v3 }
 0x13f   :  { %1432 = vmatpush3.bf16.msra.mxu0 %v1758_v9  ;;  %1183 = vmatprep.mubr.msk.f32.mxu0 %vm1675_vm0, %v1676_v1 }
 0x140   :  { %1433 = vmatprep.subr.bf16.mxu0 %v1674_v0 }
 0x143   :  { %1435 = vmatpush3.bf16.msra.mxu0 %v1761_v15 }
 0x144   :  { %1436 = vmatprep.subr.bf16.mxu0 %v1674_v0 }
 0x147   :  { %1438 = vmatpush3.bf16.msra.mxu0 %v1765_v21 }
 0x148   :  { %1439 = vmatprep.subr.bf16.mxu0 %v1674_v0 }
 0x14b   :  { %1441 = vmatpush3.bf16.msra.mxu0 %v1769_v28 }
 0x14c   :  { %1442 = vmatprep.subr.bf16.mxu0 %v1674_v0 }
 0x14f   :  { %1444 = vmatpush3.bf16.msra.mxu0 %v1773_v34 }
 0x150   :  { %1445 = vmatprep.subr.bf16.mxu0 %v1674_v0 }
 0x153   :  { %1447 = vmatpush3.bf16.msra.mxu0 %v1777_v40 }
 0x154   :  { %1448 = vmatprep.subr.bf16.mxu0 %v1674_v0 }
 0x157   :  { %1450 = vmatpush3.bf16.msra.mxu0 %v1781_v46 }
 0x158   :  { %1451 = vmatprep.subr.bf16.mxu0 %v1674_v0 }
 0x15b   :  { %1453 = vmatpush3.bf16.msra.mxu0 %v1785_v50 }
 0x15c   :  { %1478 = vmatprep.subr.bf16.mxu0 %v1674_v0 }
 0x211   :  { %v366_v12 = vpop.f32.mrb[8].mxu0 }
 0x212   :  { %v370_v13 = vadd.f32 %v366_v12, %v167_v11  ;;  %v1115_v14 = vpop.f32.mrb[9].mxu0 }
 0x214   :  { %1561 = vtanh.f32 %v370_v13 }
 0x21e   :  { %v1562_v16 = vpop.eup %1561 }
 0x21f   :  { %1149 = vmatmul.mubr.f32.vlgmr.msra.gmra.mrb[2].mxu1 %v1562_v16 }
 0x220   :  { %1456 = vmatpush3.bf16.msra.mxu1 %v1758_v9  ;;  %1218 = vmatprep.mubr.msk.f32.mxu1 %vm1675_vm0, %v1676_v1 }
 0x221   :  { %1457 = vmatprep.subr.bf16.mxu1 %v1674_v0 }
 0x224   :  { %1459 = vmatpush3.bf16.msra.mxu1 %v1761_v15 }
 0x225   :  { %1460 = vmatprep.subr.bf16.mxu1 %v1674_v0 }
 0x228   :  { %1462 = vmatpush3.bf16.msra.mxu1 %v1765_v21 }
 0x229   :  { %1463 = vmatprep.subr.bf16.mxu1 %v1674_v0 }
 0x22c   :  { %1465 = vmatpush3.bf16.msra.mxu1 %v1769_v28 }
 0x22d   :  { %1466 = vmatprep.subr.bf16.mxu1 %v1674_v0 }
 0x230   :  { %1468 = vmatpush3.bf16.msra.mxu1 %v1773_v34 }
 0x231   :  { %1469 = vmatprep.subr.bf16.mxu1 %v1674_v0 }
 0x234   :  { %1471 = vmatpush3.bf16.msra.mxu1 %v1777_v40 }
 0x235   :  { %1472 = vmatprep.subr.bf16.mxu1 %v1674_v0 }
 0x238   :  { %1474 = vmatpush3.bf16.msra.mxu1 %v1781_v46 }
 0x239   :  { %1475 = vmatprep.subr.bf16.mxu1 %v1674_v0 }
 0x23c   :  { %1477 = vmatpush3.bf16.msra.mxu1 %v1785_v50 }
 0x23d   :  { %1502 = vmatprep.subr.bf16.mxu1 %v1674_v0 }
 0x2f2   :  { %v440_v18 = vpop.f32.mrb[2].mxu1 }
 0x2f3   :  { %v444_v19 = vadd.f32 %v440_v18, %v172_v17  ;;  %v1150_v20 = vpop.f32.mrb[3].mxu1 }
 0x2f5   :  { %1563 = vtanh.f32 %v444_v19 }
 0x2ff   :  { %v1564_v22 = vpop.eup %1563 }
 0x300   :  { %1184 = vmatmul.mubr.f32.vlgmr.msra.gmra.mrb[10].mxu0 %v1564_v22 }
 0x301   :  { %1480 = vmatpush3.bf16.msra.mxu0 %v1758_v9  ;;  %1253 = vmatprep.mubr.msk.f32.mxu0 %vm1675_vm0, %v1676_v1 }
 0x302   :  { %1481 = vmatprep.subr.bf16.mxu0 %v1674_v0 }
 0x305   :  { %1483 = vmatpush3.bf16.msra.mxu0 %v1761_v15 }
 0x306   :  { %1484 = vmatprep.subr.bf16.mxu0 %v1674_v0 }
 0x309   :  { %1486 = vmatpush3.bf16.msra.mxu0 %v1765_v21 }
 0x30a   :  { %1487 = vmatprep.subr.bf16.mxu0 %v1674_v0 }
 0x30d   :  { %1489 = vmatpush3.bf16.msra.mxu0 %v1769_v28 }
 0x30e   :  { %1490 = vmatprep.subr.bf16.mxu0 %v1674_v0 }
 0x311   :  { %1492 = vmatpush3.bf16.msra.mxu0 %v1773_v34 }
 0x312   :  { %1493 = vmatprep.subr.bf16.mxu0 %v1674_v0 }
 0x315   :  { %1495 = vmatpush3.bf16.msra.mxu0 %v1777_v40 }
 0x316   :  { %1496 = vmatprep.subr.bf16.mxu0 %v1674_v0 }
 0x319   :  { %1498 = vmatpush3.bf16.msra.mxu0 %v1781_v46 }
 0x31a   :  { %1499 = vmatprep.subr.bf16.mxu0 %v1674_v0 }
 0x31d   :  { %1501 = vmatpush3.bf16.msra.mxu0 %v1785_v50 }
 0x31e   :  { %1526 = vmatprep.subr.bf16.mxu0 %v1674_v0 }
 0x3d3   :  { %v514_v24 = vpop.f32.mrb[10].mxu0 }
 0x3d4   :  { %v518_v25 = vadd.f32 %v514_v24, %v177_v23  ;;  %v1185_v26 = vpop.f32.mrb[11].mxu0 }
 0x3d6   :  { %1565 = vtanh.f32 %v518_v25 }
 0x3e0   :  { %v1566_v27 = vpop.eup %1565 }
 0x3e1   :  { %1219 = vmatmul.mubr.f32.vlgmr.msra.gmra.mrb[4].mxu1 %v1566_v27 }
 0x3e2   :  { %1504 = vmatpush3.bf16.msra.mxu1 %v1758_v9  ;;  %1288 = vmatprep.mubr.msk.f32.mxu1 %vm1675_vm0, %v1676_v1 }
 0x3e3   :  { %1505 = vmatprep.subr.bf16.mxu1 %v1674_v0 }
 0x3e6   :  { %1507 = vmatpush3.bf16.msra.mxu1 %v1761_v15 }
 0x3e7   :  { %1508 = vmatprep.subr.bf16.mxu1 %v1674_v0 }
 0x3ea   :  { %1510 = vmatpush3.bf16.msra.mxu1 %v1765_v21 }
 0x3eb   :  { %1511 = vmatprep.subr.bf16.mxu1 %v1674_v0 }
 0x3ee   :  { %1513 = vmatpush3.bf16.msra.mxu1 %v1769_v28 }
 0x3ef   :  { %1514 = vmatprep.subr.bf16.mxu1 %v1674_v0 }
 0x3f2   :  { %1516 = vmatpush3.bf16.msra.mxu1 %v1773_v34 }
 0x3f3   :  { %1517 = vmatprep.subr.bf16.mxu1 %v1674_v0 }
 0x3f6   :  { %1519 = vmatpush3.bf16.msra.mxu1 %v1777_v40 }
 0x3f7   :  { %1520 = vmatprep.subr.bf16.mxu1 %v1674_v0 }
 0x3fa   :  { %1522 = vmatpush3.bf16.msra.mxu1 %v1781_v46 }
 0x3fb   :  { %1523 = vmatprep.subr.bf16.mxu1 %v1674_v0 }
 0x3fe   :  { %1525 = vmatpush3.bf16.msra.mxu1 %v1785_v50 }
 0x4b4   :  { %v588_v30 = vpop.f32.mrb[4].mxu1 }
 0x4b5   :  { %v592_v31 = vadd.f32 %v588_v30, %v182_v29  ;;  %v1220_v32 = vpop.f32.mrb[5].mxu1 }
 0x4b7   :  { %1567 = vtanh.f32 %v592_v31 }
 0x4c1   :  { %v1568_v33 = vpop.eup %1567 }
 0x4c2   :  { %1254 = vmatmul.mubr.f32.vlgmr.msra.gmra.mrb[12].mxu0 %v1568_v33 }
 0x4c3   :  { %1528 = vmatpush3.bf16.msra.mxu0 %v1758_v9  ;;  %1323 = vmatprep.mubr.msk.f32.mxu0 %vm1675_vm0, %v1676_v1  ;;  %v187_v1 = vadd.f32 %v1852_v6, %v1831_v58 }
 0x4c4   :  { %1529 = vmatprep.subr.bf16.mxu0 %v1674_v0 }
 0x4c7   :  { %1531 = vmatpush3.bf16.msra.mxu0 %v1761_v15 }
 0x4c8   :  { %1532 = vmatprep.subr.bf16.mxu0 %v1674_v0 }
 0x4cb   :  { %1534 = vmatpush3.bf16.msra.mxu0 %v1765_v21 }
 0x4cc   :  { %1535 = vmatprep.subr.bf16.mxu0 %v1674_v0 }
 0x4cf   :  { %1537 = vmatpush3.bf16.msra.mxu0 %v1769_v28 }
 0x4d0   :  { %1538 = vmatprep.subr.bf16.mxu0 %v1674_v0 }
 0x4d3   :  { %1540 = vmatpush3.bf16.msra.mxu0 %v1773_v34  ;;  %v192_v34 = vadd.f32 %v1831_v58, %v1858_v10 }
 0x4d4   :  { %1541 = vmatprep.subr.bf16.mxu0 %v1674_v0 }
 0x4d7   :  { %1543 = vmatpush3.bf16.msra.mxu0 %v1777_v40 }
 0x4d8   :  { %1544 = vmatprep.subr.bf16.mxu0 %v1674_v0 }
 0x4db   :  { %1546 = vmatpush3.bf16.msra.mxu0 %v1781_v46 }
 0x4dc   :  { %1547 = vmatprep.subr.bf16.mxu0 %v1674_v0  ;;  %v197_v0 = vadd.f32 %v1856_v8, %v1831_v58 }
 0x4df   :  { %1549 = vmatpush3.bf16.msra.mxu0 %v1785_v50 }
 0x595   :  { %v662_v9 = vpop.f32.mrb[12].mxu0 }
 0x596   :  { %v666_v15 = vadd.f32 %v662_v9, %v187_v1  ;;  %v1255_v21 = vpop.f32.mrb[13].mxu0 }
 0x598   :  { %1569 = vtanh.f32 %v666_v15 }
 0x5a2   :  { %v1570_v28 = vpop.eup %1569 }
 0x5a3   :  { %1289 = vmatmul.mubr.f32.vlgmr.msra.gmra.mrb[6].mxu1 %v1570_v28 }
 0x676   :  { %v736_v35 = vpop.f32.mrb[6].mxu1 }
 0x677   :  { %v740_v36 = vadd.f32 %v736_v35, %v192_v34  ;;  %v1290_v37 = vpop.f32.mrb[7].mxu1 }
 0x679   :  { %1571 = vtanh.f32 %v740_v36 }
 0x683   :  { %v1572_v38 = vpop.eup %1571 }
 0x684   :  { %1324 = vmatmul.mubr.f32.vlgmr.msra.gmra.mrb[14].mxu0 %v1572_v38 }
 0x757   :  { %v810_v39 = vpop.f32.mrb[14].mxu0 }
 0x758   :  { %v814_v40 = vadd.f32 %v810_v39, %v197_v0  ;;  %v1325_v41 = vpop.f32.mrb[15].mxu0 }
 0x75a   :  { %1573 = vtanh.f32 %v814_v40 }
 0x764   :  { %v1574_v42 = vpop.eup %1573 }
 0x765   :  { %819 = vst [vmem:[#allocation10] sm:$0xff] %v1574_v42 }
 0x766   :  { %1652 = shalt.err (!%p1649_p0)
}
 0x767   :  { %s1653_s30 = scalar_lea.hbm %s1957_s4, 128 }
 0x768   :  { %p1654_p1 = scmp.ne.s32.totalorder %s1957_s4, %s1653_s30  ;;  %p1657_p2 = scmp.lt.u32.totalorder %s1653_s30, %s1957_s4 }
 0x76a   :  { %p1659_p3 = pnand %p1657_p2, %p1654_p1 }
 0x76c   :  { %1662 = shalt.err (!%p1659_p3)
}
 0x76d   :  { %834 = dma.vmem_to_hbm [thread:$0]  %s832_s26, 128, %s1957_s4, [#allocation6]  }
 0x76e   :  { %1667 = dma.done.wait [#allocation6], 128  }
 0x76f   :  { %1668 = vsyncadd [#allocation6], 4294967168 }
 0x770   :  { %838 = vsyncpa [#allocation5], 1 }
 0x771   :  { %839 = vsyncpa [#allocation8], 1 }
 0x772   :  { %840 = vsyncpa [#allocation6], 1 }

</bundles_post_ra>
